<compile_context>
chip_gen: v7x
topology: tpu7x:2x2x1
jax: 0.10.0
libtpu: 0.0.40
codegen_flags: <defaults>
</compile_context>

<pallas_src>
import jax
import jax.numpy as jnp
from jax.experimental import pallas as pl
from jax.experimental.pallas import tpu as pltpu

IN_FEATURES = 1024
OUT_FEATURES = 1
MAX_TILE_B = 512  # 512 * 1024 * 4B = 2 MiB per x buffer


def _linear_kernel(x_ref, w_ref, b_ref, o_ref):
    # x_ref: (TB, K) f32 VMEM   w_ref: (1, K) f32 VMEM (resident across grid)
    # b_ref: (1,)   f32 SMEM    o_ref: (TB, 1) f32 VMEM
    prod = x_ref[...] * w_ref[...]                       # VPU, broadcast over rows
    acc = jnp.sum(prod, axis=-1, keepdims=True)          # XLU lane reduction -> (TB, 1)
    o_ref[...] = (acc + b_ref[0]).astype(o_ref.dtype)


def _pick_tile(batch):
    # Multiple of 8 sublanes (f32), capped so double-buffered footprint is small.
    b8 = ((batch + 7) // 8) * 8
    return min(b8, MAX_TILE_B)


def binary_classifier_forward(x, weight, bias):
    """x: (B, 1024); weight: (1, 1024); bias: (1,) -> (B, 1) f32."""
    B, K = x.shape
    assert K == IN_FEATURES

    x32 = x.astype(jnp.float32)
    w = weight.astype(jnp.float32).reshape(1, K)     # lane-dense (1, K)
    b = bias.astype(jnp.float32).reshape(1)          # SMEM scalar

    TB = _pick_tile(B)
    n_tiles = pl.cdiv(B, TB)
    B_pad = n_tiles * TB
    if B_pad != B:
        x32 = jnp.pad(x32, ((0, B_pad - B), (0, 0)))

    out = pl.pallas_call(
        _linear_kernel,
        out_shape=jax.ShapeDtypeStruct((B_pad, OUT_FEATURES), jnp.float32),
        grid_spec=pltpu.PrefetchScalarGridSpec(
            num_scalar_prefetch=0,
            grid=(n_tiles,),
            in_specs=[
                pl.BlockSpec((TB, K), lambda i: (i, 0)),                 # streamed x tile
                pl.BlockSpec((1, K), lambda i: (0, 0)),                  # resident weight
                pl.BlockSpec(memory_space=pltpu.MemorySpace.SMEM),       # bias scalar
            ],
            out_specs=pl.BlockSpec((TB, OUT_FEATURES), lambda i: (i, 0)),
        ),
        compiler_params=pltpu.CompilerParams(
            dimension_semantics=("parallel",),
        ),
    )(x32, w, b)

    return out[:B] if B_pad != B else out


if __name__ == "__main__":
    key = jax.random.PRNGKey(0)
    kx, kw, kb = jax.random.split(key, 3)

    B = 8
    x = jax.random.normal(kx, (B, IN_FEATURES), dtype=jnp.float32)

    # Deterministic parameter init (mimics nn.Linear's uniform(-1/sqrt(K), 1/sqrt(K)))
    bound = 1.0 / jnp.sqrt(jnp.float32(IN_FEATURES))
    weight = jax.random.uniform(
        kw, (OUT_FEATURES, IN_FEATURES), minval=-bound, maxval=bound, dtype=jnp.float32
    )
    bias = jax.random.uniform(
        kb, (OUT_FEATURES,), minval=-bound, maxval=bound, dtype=jnp.float32
    )

    out = binary_classifier_forward(x, weight, bias)
    out = jax.block_until_ready(out)

    # Pure-JAX reference check
    ref = x @ weight.T + bias
    assert out.shape == (B, OUT_FEATURES)
    assert jnp.allclose(out, ref, atol=1e-5, rtol=1e-4)

    print("KERNEL_OK")
</pallas_src>

<mosaic_0001>
module attributes {stable_mosaic.version = 11 : i64} {
  func.func @_linear_kernel(%arg0: i32, %arg1: memref<8x1024xf32, #tpu.memory_space<vmem>>, %arg2: memref<1x1024xf32, #tpu.memory_space<vmem>>, %arg3: memref<1xf32, #tpu.memory_space<smem>>, %arg4: memref<8x1xf32, #tpu.memory_space<vmem>>) attributes {dimension_semantics = [#tpu.dimension_semantics<parallel>], iteration_bounds = array<i64: 1>, scalar_prefetch = 0 : i64, scratch_operands = 0 : i64, tpu.core_type = #tpu.core_type<tc>, window_params = [{transform_indices = @transform_0, window_bounds = array<i64: 8, 1024>}, {pipeline_mode = #tpu.pipeline_mode<synchronous>, transform_indices = @transform_1, window_bounds = array<i64: 1, 1024>}, {transform_indices = @transform_2, window_bounds = array<i64: 1>}, {transform_indices = @transform_3, window_bounds = array<i64: 8, 1>}]} {
    %c0 = arith.constant 0 : index
    %c0_0 = arith.constant 0 : index
    %0 = vector.load %arg1[%c0, %c0_0] : memref<8x1024xf32, #tpu.memory_space<vmem>>, vector<8x1024xf32>
    %c0_1 = arith.constant 0 : index
    %c0_2 = arith.constant 0 : index
    %1 = vector.load %arg2[%c0_1, %c0_2] : memref<1x1024xf32, #tpu.memory_space<vmem>>, vector<1x1024xf32>
    %2 = vector.broadcast %1 : vector<1x1024xf32> to vector<8x1024xf32>
    %3 = arith.mulf %0, %2 : vector<8x1024xf32>
    %cst = arith.constant dense<0.000000e+00> : vector<8xf32>
    %4 = vector.multi_reduction <add>, %3, %cst [1] : vector<8x1024xf32> to vector<8xf32>
    %5 = vector.shape_cast %4 : vector<8xf32> to vector<8x1xf32>
    %c0_3 = arith.constant 0 : index
    %6 = memref.load %arg3[%c0_3] : memref<1xf32, #tpu.memory_space<smem>>
    %7 = vector.broadcast %6 : f32 to vector<8x1xf32>
    %8 = arith.addf %5, %7 : vector<8x1xf32>
    %c0_4 = arith.constant 0 : index
    %c0_5 = arith.constant 0 : index
    %9 = vector.load %arg4[%c0_4, %c0_5] : memref<8x1xf32, #tpu.memory_space<vmem>>, vector<8x1xf32>
    tpu.vector_store %arg4[%c0_4, %c0_5], %8 {strides = array<i32>} : memref<8x1xf32, #tpu.memory_space<vmem>>, vector<8x1xf32>,
    return
  }
  func.func @transform_0(%arg0: i32) -> (i32, i32) {
    %c0_i32 = arith.constant 0 : i32
    %c0_i32_0 = arith.constant 0 : i32
    return %arg0, %c0_i32 : i32, i32
  }
  func.func @transform_1(%arg0: i32) -> (i32, i32) {
    %c0_i32 = arith.constant 0 : i32
    %c0_i32_0 = arith.constant 0 : i32
    %c0_i32_1 = arith.constant 0 : i32
    return %c0_i32, %c0_i32_0 : i32, i32
  }
  func.func @transform_2(%arg0: i32) -> i32 {
    %c0_i32 = arith.constant 0 : i32
    %c0_i32_0 = arith.constant 0 : i32
    return %c0_i32 : i32
  }
  func.func @transform_3(%arg0: i32) -> (i32, i32) {
    %c0_i32 = arith.constant 0 : i32
    %c0_i32_0 = arith.constant 0 : i32
    return %arg0, %c0_i32 : i32, i32
  }
}

</mosaic_0001>

<bundles_post_ra>
// kernel: tpu_custom_call.1
= control target key start
LH: loop header
LB: loop body
LE: loop exit
PB: predicated region body
PF: predicated region fallthrough
CT: control target
= control target key end

     0   :  { %9 = vsyncpa [#allocation4], 0  ;;  %s219_s0 = inlined_call_operand.hbm [shape: f32[8,1024], index: 0, kind: input, shape index: {}]   ;;  %s220_s1 = inlined_call_operand.hbm [shape: f32[1,1024], index: 1, kind: input, shape index: {}]   ;;  %s221_s2 = inlined_call_operand.<no memory space> [shape: f32[1], index: 2, kind: input, shape index: {}]   ;;  %s222_s3 = inlined_call_operand.vmem [shape: f32[8,1], index: 3, kind: output, shape index: {}]  }
   0x1   :  { %10 = vsyncpa [#allocation6], 0  ;;  %s167_s12 = smov [#allocation3]   ;;  %s168_s14 = smov [#allocation5]  }
   0x2   :  { %s17_s13 = sshll.u32 %s167_s12, 4  ;;  %s27_s15 = sshll.u32 %s168_s14, 4  ;;  %s18_s13 = int_to_ptr.vmem [resolvable:$true] %s17_s13  ;;  %s28_s15 = int_to_ptr.vmem [resolvable:$true] %s27_s15 }
   0x3   :  { %s119_s18 = scalar_lea.hbm %s219_s0, 1024 }
   0x4   :  { %p120_p0 = scmp.ne.s32.totalorder %s219_s0, %s119_s18  ;;  %p123_p1 = scmp.lt.u32.totalorder %s119_s18, %s219_s0 }
   0x6   :  { %p125_p2 = pnand %p123_p1, %p120_p0 }
   0x8   :  { %128 = shalt.err (!%p125_p2)
}
   0x9   :  { %s129_s23 = scalar_lea.vmem %s18_s13, 1024  ;;  %p134_p4 = scmp.lt.s32.totalorder %s18_s13, %s18_s13 }
   0xa   :  { %p130_p3 = scmp.ne.s32.totalorder %s18_s13, %s129_s23  ;;  %p135_p5 = scmp.lt.s32.totalorder %s129_s23, %s129_s23 }
   0xc   :  { %p136_p6 = por %p135_p5, %p134_p4 }
   0xe   :  { %p137_p7 = pnand %p136_p6, %p130_p3 }
  0x10   :  { %140 = shalt.err (!%p137_p7)
}
  0x11   :  { %20 = dma.hbm_to_vmem [thread:$0]  %s219_s0, 1024, %s18_s13, [#allocation4]  }
  0x12   :  { %s141_s28 = scalar_lea.hbm %s220_s1, 128 }
  0x13   :  { %p142_p8 = scmp.ne.s32.totalorder %s220_s1, %s141_s28  ;;  %p145_p9 = scmp.lt.u32.totalorder %s141_s28, %s220_s1 }
  0x15   :  { %p147_p10 = pnand %p145_p9, %p142_p8 }
  0x17   :  { %150 = shalt.err (!%p147_p10)
}
  0x18   :  { %s151_s6 = scalar_lea.vmem %s28_s15, 128  ;;  %p156_p12 = scmp.lt.s32.totalorder %s28_s15, %s28_s15 }
  0x19   :  { %p152_p11 = scmp.ne.s32.totalorder %s28_s15, %s151_s6  ;;  %p157_p13 = scmp.lt.s32.totalorder %s151_s6, %s151_s6 }
  0x1b   :  { %p158_p0 = por %p157_p13, %p156_p12 }
  0x1d   :  { %p159_p1 = pnand %p158_p0, %p152_p11 }
  0x1f   :  { %162 = shalt.err (!%p159_p1)
}
  0x20   :  { %30 = dma.hbm_to_vmem [thread:$0]  %s220_s1, 128, %s28_s15, [#allocation6]  }
  0x21   :  { %163 = dma.done.wait [#allocation4], 1024  }
  0x22   :  { %164 = vsyncadd [#allocation4], 4294966272 }
  0x23   :  { %165 = dma.done.wait [#allocation6], 128  }
  0x24   :  { %166 = vsyncadd [#allocation6], 4294967168  ;;  %v49_v0 = vlaneseq  ;;  %v39_v6 = vld [vmem:[#allocation3] sm:$0xff]  ;;  %v40_v8 = vld [vmem:[#allocation3 + $0x8] sm:$0xff]  ;;  %v107_v42 = vstv %s221_s2  ;;  %vm109_vm0 = vcmask 7168  }
  0x25   :  { %v41_v9 = vld [vmem:[#allocation3 + $0x10] sm:$0xff]  ;;  %v47_v10 = vld [vmem:[#allocation5] sm:$0xff]  ;;  %v42_v16 = vld [vmem:[#allocation3 + $0x18] sm:$0xff] }
  0x26   :  { %v50_v1 = vshrl.u32 %v49_v0, 7  ;;  %v43_v22 = vld [vmem:[#allocation3 + $0x20] sm:$0xff]  ;;  %v44_v27 = vld [vmem:[#allocation3 + $0x28] sm:$0xff]  ;;  %v45_v31 = vld [vmem:[#allocation3 + $0x30] sm:$0xff] }
  0x27   :  { %v46_v35 = vld [vmem:[#allocation3 + $0x38] sm:$0xff] }
  0x28   :  { %v51_v2 = vsub.s32 0, %v50_v1  ;;  %v55_v3 = vsub.s32 1, %v50_v1  ;;  %v59_v4 = vsub.s32 2, %v50_v1  ;;  %v63_v5 = vsub.s32 3, %v50_v1 }
  0x29   :  { %v67_v7 = vsub.s32 4, %v50_v1  ;;  %v71_v11 = vsub.s32 5, %v50_v1  ;;  %v75_v17 = vsub.s32 6, %v50_v1  ;;  %v79_v24 = vsub.s32 7, %v50_v1 }
  0x2a   :  { %v52_v12 = vrot.slane %v47_v10, %v51_v2  ;;  %v56_v13 = vrot.slane %v47_v10, %v55_v3  ;;  %v60_v14 = vrot.slane %v47_v10, %v59_v4  ;;  %v64_v15 = vrot.slane %v47_v10, %v63_v5 }
  0x2b   :  { %v68_v18 = vrot.slane %v47_v10, %v67_v7  ;;  %v72_v23 = vrot.slane %v47_v10, %v71_v11  ;;  %v76_v28 = vrot.slane %v47_v10, %v75_v17  ;;  %v80_v32 = vrot.slane %v47_v10, %v79_v24 }
  0x2c   :  { %v89_v19 = vmul.f32 %v52_v12, %v39_v6  ;;  %v90_v20 = vmul.f32 %v56_v13, %v40_v8  ;;  %v91_v21 = vmul.f32 %v60_v14, %v41_v9  ;;  %v92_v25 = vmul.f32 %v64_v15, %v42_v16 }
  0x2d   :  { %v93_v29 = vmul.f32 %v68_v18, %v43_v22  ;;  %v94_v33 = vmul.f32 %v72_v23, %v44_v27  ;;  %v95_v36 = vmul.f32 %v76_v28, %v45_v31  ;;  %v96_v38 = vmul.f32 %v80_v32, %v46_v35 }
  0x2e   :  { %v97_v26 = vadd.f32 %v90_v20, %v89_v19 }
  0x30   :  { %v98_v30 = vadd.f32 %v97_v26, %v91_v21 }
  0x32   :  { %v99_v34 = vadd.f32 %v98_v30, %v92_v25 }
  0x34   :  { %v100_v37 = vadd.f32 %v99_v34, %v93_v29 }
  0x36   :  { %v101_v39 = vadd.f32 %v100_v37, %v94_v33 }
  0x38   :  { %v102_v40 = vadd.f32 %v101_v39, %v95_v36 }
  0x3a   :  { %v103_v41 = vadd.f32 %v102_v40, %v96_v38 }
  0x3c   :  { %104 = vadd.xlane.f32.xlu0 %v103_v41 }
  0xc9   :  { %v105_v43 = vpop.xlane.xlu0 %104 }
  0xca   :  { %v108_v44 = vadd.f32 %v107_v42, %v105_v43 }
  0xcc   :  { %110 = vst.msk [vmem:[%s222_s3] sm:$0xff] %vm109_vm0, %v108_v44 }
  0xcd   :  { %115 = vsyncpa [#allocation4], 1 }
  0xce   :  { %116 = vsyncpa [#allocation6], 1 }

</bundles_post_ra>
